<compile_context>
chip_gen: v7x
topology: tpu7x:2x2x1
jax: 0.10.0
libtpu: 0.0.40
codegen_flags: <defaults>
</compile_context>

<pallas_src>
import functools
import math
from typing import NamedTuple

import jax
import jax.numpy as jnp
from jax.experimental import pallas as pl
from jax.experimental.pallas import tpu as pltpu

_LANES = 128
_SUBLANES = 8
_SLAB_LANES = 512        # lane width of the dequant/quant slab
_SLAB_ROW_TILE = 512     # 512 x 512 f32 = 1 MiB per pipelined buffer


class MolBatch(NamedTuple):
    pos: jax.Array       # (M, N, 3)  molecules, atoms, xyz
    vel: jax.Array       # (M, N, 3)
    h: jax.Array         # (M, N, DH)
    g: jax.Array         # (M, N, DG)
    num_atoms: int
    num_mols: int


# --------------------------------------------------------------------------
# Per-generation VMEM budgets (v5e/v6e: 128 MiB physical, v7x: 64 MiB).
# --------------------------------------------------------------------------
def _vmem_budget():
    try:
        cap = int(getattr(pltpu.get_tpu_info(), "vmem_capacity_bytes", 64 << 20))
    except Exception:  # best-effort hardware query
        cap = 64 << 20
    if cap >= (100 << 20):            # v5e / v6e
        return 10 << 20, 64 << 20     # (per-block working-set budget, vmem limit)
    return 6 << 20, 32 << 20          # v7x or unknown: stay conservative


def _block_molecules(m, per_mol_bytes, budget_bytes, max_tm=256):
    """Molecules per grid block; never exceeds the VMEM budget (TM=1 floor)."""
    cap = max(1, int(budget_bytes) // max(int(per_mol_bytes), 1))
    cap = min(cap, max_tm)
    if cap >= m:
        return m, m                                   # one block, no padding
    tm = cap if cap < _SUBLANES else (cap // _SUBLANES) * _SUBLANES
    m_pad = -(-m // tm) * tm
    return tm, m_pad


# --------------------------------------------------------------------------
# Input prep for the LJ / nll kernels.
# dist^2[i,j] = lhs[i] . rhs[j] with lhs=[p, |p|^2, 1, 0..], rhs=[-2p, 1, |p|^2, 0..]
# so the whole pairwise matrix is one batched MXU matmul.
# --------------------------------------------------------------------------
def _prep_pair_operands(pos, m_pad, n_pad):
    m, n, d = pos.shape
    p = pos.astype(jnp.float32)
    sq = jnp.sum(p * p, axis=-1, keepdims=True)                # (M, N, 1)
    ones = jnp.ones_like(sq)
    zeros = jnp.zeros((m, n, 8 - d - 2), jnp.float32)
    lhs = jnp.concatenate([p, sq, ones, zeros], axis=-1)       # (M, N, 8)
    rhs = jnp.concatenate([-2.0 * p, ones, sq, zeros], axis=-1)
    pad = ((0, m_pad - m), (0, n_pad - n), (0, 0))
    return jnp.pad(lhs, pad), jnp.pad(rhs, pad)


def _prep_features(vel, h, g, m_pad):
    m = vel.shape[0]
    f = jnp.concatenate(
        [vel.reshape(m, -1), h.reshape(m, -1), g.reshape(m, -1)], axis=1
    ).astype(jnp.float32)
    f_dim = f.shape[1]
    f_pad = -(-f_dim // _LANES) * _LANES
    f = jnp.pad(f, ((0, m_pad - m), (0, f_pad - f_dim)))
    return f.reshape(m_pad, 1, f_pad)


# --------------------------------------------------------------------------
# Lennard-Jones per-block per-lane partial sums.
# --------------------------------------------------------------------------
def _lj_block_partial(lhs, rhs, softening, n_real):
    n_pad = lhs.shape[1]
    # (TM, N, N) pair matrix on the MXU (VALU was the binding slot before).
    dist_sq = jnp.einsum('bnd,bmd->bnm', lhs, rhs,
                         preferred_element_type=jnp.float32)
    dist_sq = jnp.maximum(dist_sq, 0.0)
    row = jax.lax.broadcasted_iota(jnp.int32, (n_pad, n_pad), 0)
    col = jax.lax.broadcasted_iota(jnp.int32, (n_pad, n_pad), 1)
    valid = (row != col) & (row < n_real) & (col < n_real)
    mask = valid[None] & (dist_sq > 0.0)
    x = dist_sq + softening
    inv = pl.reciprocal(x, approx=True)        # EUP slot
    inv = inv * (2.0 - x * inv)                # one Newton step (r^-12 amplifies err)
    inv6 = inv * inv * inv
    energy = jnp.where(mask, inv6 * (inv6 - 1.0), 0.0)
    part = jnp.sum(jnp.sum(energy, axis=0), axis=0)       # (N_pad,) per-lane partials
    return 2.0 * part          # 0.5 (symmetric double count) * 4 (LJ prefactor)


def _nll_partials_kernel(lhs_ref, rhs_ref, feat_ref, lj_out, ssq_out, *,
                         softening, n_real):
    lj_out[...] = _lj_block_partial(lhs_ref[...], rhs_ref[...],
                                    softening, n_real)[None, None, :]
    f = feat_ref[...]                                        # (TM, 1, F_pad)
    ssq_out[...] = jnp.sum(f * f, axis=0, keepdims=True)     # (1, 1, F_pad)


def _lj_kernel(lhs_ref, rhs_ref, lj_out, *, softening, n_real):
    lj_out[...] = _lj_block_partial(lhs_ref[...], rhs_ref[...],
                                    softening, n_real)[None, None, :]


def nll_partials(pos, vel, h, g, softening):
    m, n, _ = pos.shape
    n_pad = max(_SUBLANES, -(-n // _SUBLANES) * _SUBLANES)
    f_dim = n * (vel.shape[-1] + h.shape[-1] + g.shape[-1])
    f_pad = -(-f_dim // _LANES) * _LANES
    budget, vmem_limit = _vmem_budget()
    per_mol = 28 * n_pad * n_pad + 2048 * n_pad + 8 * f_pad
    tm, m_pad = _block_molecules(m, per_mol, budget)
    grid_n = m_pad // tm

    lhs, rhs = _prep_pair_operands(pos, m_pad, n_pad)
    feat = _prep_features(vel, h, g, m_pad)

    lj_parts, ssq_parts = pl.pallas_call(
        functools.partial(_nll_partials_kernel, softening=float(softening),
                          n_real=n),
        out_shape=(jax.ShapeDtypeStruct((grid_n, 1, n_pad), jnp.float32),
                   jax.ShapeDtypeStruct((grid_n, 1, feat.shape[-1]), jnp.float32)),
        grid=(grid_n,),
        in_specs=[
            pl.BlockSpec((tm, n_pad, 8), lambda i: (i, 0, 0)),
            pl.BlockSpec((tm, n_pad, 8), lambda i: (i, 0, 0)),
            pl.BlockSpec((tm, 1, feat.shape[-1]), lambda i: (i, 0, 0)),
        ],
        out_specs=(pl.BlockSpec((1, 1, n_pad), lambda i: (i, 0, 0)),
                   pl.BlockSpec((1, 1, feat.shape[-1]), lambda i: (i, 0, 0))),
        compiler_params=pltpu.CompilerParams(
            dimension_semantics=("parallel",),
            vmem_limit_bytes=vmem_limit),
    )(lhs, rhs, feat)
    return jnp.sum(lj_parts), jnp.sum(ssq_parts)


def lj_potential(pos, softening):
    m, n, _ = pos.shape
    n_pad = max(_SUBLANES, -(-n // _SUBLANES) * _SUBLANES)
    budget, vmem_limit = _vmem_budget()
    per_mol = 28 * n_pad * n_pad + 2048 * n_pad
    tm, m_pad = _block_molecules(m, per_mol, budget)
    grid_n = m_pad // tm
    lhs, rhs = _prep_pair_operands(pos, m_pad, n_pad)

    lj_parts = pl.pallas_call(
        functools.partial(_lj_kernel, softening=float(softening), n_real=n),
        out_shape=jax.ShapeDtypeStruct((grid_n, 1, n_pad), jnp.float32),
        grid=(grid_n,),
        in_specs=[pl.BlockSpec((tm, n_pad, 8), lambda i: (i, 0, 0)),
                  pl.BlockSpec((tm, n_pad, 8), lambda i: (i, 0, 0))],
        out_specs=pl.BlockSpec((1, 1, n_pad), lambda i: (i, 0, 0)),
        compiler_params=pltpu.CompilerParams(
            dimension_semantics=("parallel",),
            vmem_limit_bytes=vmem_limit),
    )(lhs, rhs)
    return jnp.sum(lj_parts)


# --------------------------------------------------------------------------
# Dequantize / quantize on a lane-dense (rows, 512) slab, 1 MiB blocks.
# --------------------------------------------------------------------------
def _to_slab(x):
    flat = x.reshape(-1).astype(jnp.float32)
    n = flat.shape[0]
    rows = -(-n // _SLAB_LANES)
    rows = max(_SUBLANES, -(-rows // _SUBLANES) * _SUBLANES)
    row_tile = min(_SLAB_ROW_TILE, rows)
    rows = -(-rows // row_tile) * row_tile
    pad = rows * _SLAB_LANES - n
    if pad:
        flat = jnp.concatenate([flat, jnp.zeros((pad,), jnp.float32)])
    return flat.reshape(rows, _SLAB_LANES), n, row_tile


def _from_slab(slab, n, shape):
    return slab.reshape(-1)[:n].reshape(shape)


def _dequant_prng_kernel(seed_ref, z_ref, out_ref, *, scale):
    # In-kernel HW PRNG: no extra HBM noise stream.
    pltpu.prng_seed(seed_ref[0], pl.program_id(0))
    bits = pltpu.prng_random_bits(z_ref.shape)
    if bits.dtype != jnp.uint32:
        bits = pltpu.bitcast(bits, jnp.uint32)
    mant = (bits >> 9) | jnp.uint32(0x3F800000)
    u = pltpu.bitcast(mant, jnp.float32) - 1.0       # U[0, 1)
    out_ref[...] = z_ref[...] + scale * u


def _dequant_ext_kernel(z_ref, u_ref, out_ref, *, scale):
    out_ref[...] = z_ref[...] + scale * u_ref[...]


def dequantize(z, dequant_scale, key):
    slab, n, tr = _to_slab(z)
    grid = (slab.shape[0] // tr,)
    blk = pl.BlockSpec((tr, _SLAB_LANES), lambda i: (i, 0))
    params = pltpu.CompilerParams(dimension_semantics=("parallel",),
                                  vmem_limit_bytes=32 << 20)
    try:
        seed = jax.random.randint(key, (1,), 0, jnp.iinfo(jnp.int32).max,
                                  dtype=jnp.int32)
        out = pl.pallas_call(
            functools.partial(_dequant_prng_kernel, scale=float(dequant_scale)),
            out_shape=jax.ShapeDtypeStruct(slab.shape, jnp.float32),
            grid=grid,
            in_specs=[pl.BlockSpec(memory_space=pltpu.MemorySpace.SMEM), blk],
            out_specs=blk,
            compiler_params=params,
        )(seed, slab)
        out = jax.block_until_ready(out)
    except Exception:
        # TODO(synk): fallback for targets without the in-kernel HW PRNG
        # lowering (e.g. interpret mode) — costs one extra HBM noise stream.
        u = jax.random.uniform(key, slab.shape, jnp.float32)
        out = pl.pallas_call(
            functools.partial(_dequant_ext_kernel, scale=float(dequant_scale)),
            out_shape=jax.ShapeDtypeStruct(slab.shape, jnp.float32),
            grid=grid,
            in_specs=[blk, blk],
            out_specs=blk,
            compiler_params=params,
        )(slab, u)
    return _from_slab(out, n, z.shape)


def _quant_kernel(z_ref, out_ref):
    out_ref[...] = jnp.floor(z_ref[...])


def quantize(z):
    slab, n, tr = _to_slab(z)
    blk = pl.BlockSpec((tr, _SLAB_LANES), lambda i: (i, 0))
    out = pl.pallas_call(
        _quant_kernel,
        out_shape=jax.ShapeDtypeStruct(slab.shape, jnp.float32),
        grid=(slab.shape[0] // tr,),
        in_specs=[blk],
        out_specs=blk,
        compiler_params=pltpu.CompilerParams(
            dimension_semantics=("parallel",), vmem_limit_bytes=32 << 20),
    )(slab)
    return _from_slab(out, n, z.shape)


# --------------------------------------------------------------------------
# BaseFlow in JAX/Pallas.
# --------------------------------------------------------------------------
class BaseFlowPallas:
    # Referenced but not defined in the PyTorch base class (subclass
    # responsibility) — fixed deterministic values here.
    softening = 0.1
    z_lj = 1.0
    kBT = 1.0

    def __init__(self, n_iter, dt, r_cut, box, dequant_scale=1.0):
        self.n_iter = n_iter
        self.dt = dt
        self.dt_2 = 0.5 * dt
        self.r_cut = r_cut
        self.box = box
        self.dequant_scale = dequant_scale
        # TODO(synk): self.networks = ModuleList(self.make_networks(network))
        # cannot be reproduced — make_networks is undefined in the base class.

    def get_lj_potential(self, data):
        return lj_potential(data.pos, self.softening)

    def nll(self, out, ldj):
        lj, ssq = nll_partials(out.pos, out.vel, out.h, out.g, self.softening)
        H = lj + 0.5 * ssq
        dh = out.h.shape[-1]
        logZ = -out.num_atoms * (
            math.log(self.z_lj) - (1.5 + dh) * math.log(2.0 * math.pi * self.kBT)
        )
        log_px = -H / self.kBT + logZ + ldj
        return -log_px / out.num_mols

    def dequantize(self, z, key=None):
        if key is None:
            key = jax.random.PRNGKey(0)
        return dequantize(z, self.dequant_scale, key)

    def quantize(self, z):
        return quantize(z)

    def forward(self, data):
        # TODO(synk): abstract (`pass`) in the PyTorch base class.
        return None

    def reverse(self, data):
        # TODO(synk): abstract (`pass`) in the PyTorch base class.
        return None


# --------------------------------------------------------------------------
# Pure-JAX (f32) references for correctness checks.
# --------------------------------------------------------------------------
def _lj_reference(pos, softening):
    p = pos.astype(jnp.float32)
    diff = p[:, :, None, :] - p[:, None, :, :]
    d2 = jnp.sum(diff * diff, axis=-1)
    n = p.shape[1]
    iu = jnp.triu(jnp.ones((n, n), bool), k=1)
    mask = iu[None, :, :] & (d2 != 0.0)
    r6 = (d2 + softening) ** 3
    e = 4.0 * (1.0 / (r6 * r6) - 1.0 / r6)
    return jnp.sum(jnp.where(mask, e, 0.0))


def _nll_reference(data, ldj, softening, z_lj, kBT):
    ssq = (jnp.sum(data.vel.astype(jnp.float32) ** 2)
           + jnp.sum(data.h.astype(jnp.float32) ** 2)
           + jnp.sum(data.g.astype(jnp.float32) ** 2))
    H = _lj_reference(data.pos, softening) + 0.5 * ssq
    dh = data.h.shape[-1]
    logZ = -data.num_atoms * (
        math.log(z_lj) - (1.5 + dh) * math.log(2.0 * math.pi * kBT))
    log_px = -H / kBT + logZ + ldj
    return -log_px / data.num_mols


def _check_close(name, got, want, rtol=2e-2, atol=5e-2):
    got_f, want_f = float(got), float(want)
    if not (abs(got_f - want_f) <= atol + rtol * abs(want_f)):
        raise AssertionError(f"{name}: got {got_f}, want {want_f}")


if __name__ == "__main__":
    key = jax.random.PRNGKey(0)
    k1, k2, k3, k4, k5 = jax.random.split(key, 5)

    # Case 1: small molecule batch.
    M, N, DH, DG = 2, 8, 4, 2
    pos = jax.random.normal(k1, (M, N, 3), jnp.float32) * 2.0
    vel = jax.random.normal(k2, (M, N, 3), jnp.float32)
    h = jax.random.normal(k3, (M, N, DH), jnp.float32)
    g = jax.random.normal(k4, (M, N, DG), jnp.float32)
    data = MolBatch(pos, vel, h, g, M * N, M)

    flow = BaseFlowPallas(n_iter=4, dt=0.01, r_cut=2.5, box=5.0,
                          dequant_scale=1.0)

    z = jnp.abs(pos) * 3.0
    dz = flow.dequantize(z, key=k5)
    qz = flow.quantize(dz)
    H = flow.get_lj_potential(data)
    loss = flow.nll(data, ldj=jnp.float32(0.0))
    jax.block_until_ready((dz, qz, H, loss))

    noise = dz - z
    assert bool(jnp.all((noise >= 0.0) & (noise < flow.dequant_scale + 1e-6)))
    assert bool(jnp.all(qz == jnp.floor(dz)))
    _check_close("lj", H, _lj_reference(pos, flow.softening))
    _check_close("nll", loss,
                 _nll_reference(data, 0.0, flow.softening, flow.z_lj, flow.kBT))

    # Case 2: larger batch — exercises molecule/atom/feature padding and a
    # multi-block "parallel" grid.
    M2, N2, DH2, DG2 = 300, 12, 6, 3
    kk = jax.random.split(k5, 4)
    pos2 = jax.random.normal(kk[0], (M2, N2, 3), jnp.float32) * 1.5
    vel2 = jax.random.normal(kk[1], (M2, N2, 3), jnp.float32)
    h2 = jax.random.normal(kk[2], (M2, N2, DH2), jnp.float32)
    g2 = jax.random.normal(kk[3], (M2, N2, DG2), jnp.float32)
    data2 = MolBatch(pos2, vel2, h2, g2, M2 * N2, M2)
    H2 = flow.get_lj_potential(data2)
    loss2 = flow.nll(data2, ldj=jnp.float32(1.5))
    jax.block_until_ready((H2, loss2))
    _check_close("lj2", H2, _lj_reference(pos2, flow.softening))
    _check_close("nll2", loss2,
                 _nll_reference(data2, 1.5, flow.softening, flow.z_lj, flow.kBT))

    print("KERNEL_OK")
</pallas_src>

<mosaic_0001>
module attributes {stable_mosaic.version = 11 : i64} {
  func.func @_dequant_prng_kernel(%arg0: i32, %arg1: memref<1xi32, #tpu.memory_space<smem>>, %arg2: memref<8x512xf32, #tpu.memory_space<vmem>>, %arg3: memref<8x512xf32, #tpu.memory_space<vmem>>) attributes {dimension_semantics = [#tpu.dimension_semantics<parallel>], iteration_bounds = array<i64: 1>, scalar_prefetch = 0 : i64, scratch_operands = 0 : i64, tpu.core_type = #tpu.core_type<tc>, window_params = [{transform_indices = @transform_0, window_bounds = array<i64: 1>}, {transform_indices = @transform_1, window_bounds = array<i64: 8, 512>}, {transform_indices = @transform_2, window_bounds = array<i64: 8, 512>}]} {
    %c0 = arith.constant 0 : index
    %0 = memref.load %arg1[%c0] : memref<1xi32, #tpu.memory_space<smem>>
    "tpu.prng_set_seed_32"(%0, %arg0) : (i32, i32) -> ()
    %1 = "tpu.prng_random_bits"() : () -> vector<8x512xi32>
    %2 = tpu.bitcast %1 : vector<8x512xi32> -> vector<8x512xi32>
    %c9_i32 = arith.constant 9 : i32
    %3 = vector.broadcast %c9_i32 : i32 to vector<8x512xi32>
    %4 = arith.shrui %2, %3 : vector<8x512xi32>
    %c1065353216_i32 = arith.constant 1065353216 : i32
    %5 = vector.broadcast %c1065353216_i32 : i32 to vector<8x512xi32>
    %6 = arith.ori %4, %5 : vector<8x512xi32>
    %7 = tpu.bitcast %6 : vector<8x512xi32> -> vector<8x512xf32>
    %cst = arith.constant 1.000000e+00 : f32
    %8 = vector.broadcast %cst : f32 to vector<8x512xf32>
    %9 = arith.subf %7, %8 : vector<8x512xf32>
    %c0_0 = arith.constant 0 : index
    %c0_1 = arith.constant 0 : index
    %10 = vector.load %arg2[%c0_0, %c0_1] : memref<8x512xf32, #tpu.memory_space<vmem>>, vector<8x512xf32>
    %cst_2 = arith.constant 1.000000e+00 : f32
    %11 = vector.broadcast %cst_2 : f32 to vector<8x512xf32>
    %12 = arith.mulf %11, %9 : vector<8x512xf32>
    %13 = arith.addf %10, %12 : vector<8x512xf32>
    %c0_3 = arith.constant 0 : index
    %c0_4 = arith.constant 0 : index
    %14 = vector.load %arg3[%c0_3, %c0_4] : memref<8x512xf32, #tpu.memory_space<vmem>>, vector<8x512xf32>
    tpu.vector_store %arg3[%c0_3, %c0_4], %13 {strides = array<i32>} : memref<8x512xf32, #tpu.memory_space<vmem>>, vector<8x512xf32>,
    return
  }
  func.func @transform_0(%arg0: i32) -> i32 {
    %c0_i32 = arith.constant 0 : i32
    %c0_i32_0 = arith.constant 0 : i32
    return %c0_i32 : i32
  }
  func.func @transform_1(%arg0: i32) -> (i32, i32) {
    %c0_i32 = arith.constant 0 : i32
    %c0_i32_0 = arith.constant 0 : i32
    return %arg0, %c0_i32 : i32, i32
  }
  func.func @transform_2(%arg0: i32) -> (i32, i32) {
    %c0_i32 = arith.constant 0 : i32
    %c0_i32_0 = arith.constant 0 : i32
    return %arg0, %c0_i32 : i32, i32
  }
}

module attributes {stable_mosaic.version = 11 : i64} {
  func.func @_dequant_ext_kernel(%arg0: i32, %arg1: memref<8x512xf32, #tpu.memory_space<vmem>>, %arg2: memref<8x512xf32, #tpu.memory_space<vmem>>, %arg3: memref<8x512xf32, #tpu.memory_space<vmem>>) attributes {dimension_semantics = [#tpu.dimension_semantics<parallel>], iteration_bounds = array<i64: 1>, scalar_prefetch = 0 : i64, scratch_operands = 0 : i64, tpu.core_type = #tpu.core_type<tc>, window_params = [{transform_indices = @transform_0, window_bounds = array<i64: 8, 512>}, {transform_indices = @transform_1, window_bounds = array<i64: 8, 512>}, {transform_indices = @transform_2, window_bounds = array<i64: 8, 512>}]} {
    %c0 = arith.constant 0 : index
    %c0_0 = arith.constant 0 : index
    %0 = vector.load %arg1[%c0, %c0_0] : memref<8x512xf32, #tpu.memory_space<vmem>>, vector<8x512xf32>
    %c0_1 = arith.constant 0 : index
    %c0_2 = arith.constant 0 : index
    %1 = vector.load %arg2[%c0_1, %c0_2] : memref<8x512xf32, #tpu.memory_space<vmem>>, vector<8x512xf32>
    %cst = arith.constant 1.000000e+00 : f32
    %2 = vector.broadcast %cst : f32 to vector<8x512xf32>
    %3 = arith.mulf %2, %1 : vector<8x512xf32>
    %4 = arith.addf %0, %3 : vector<8x512xf32>
    %c0_3 = arith.constant 0 : index
    %c0_4 = arith.constant 0 : index
    %5 = vector.load %arg3[%c0_3, %c0_4] : memref<8x512xf32, #tpu.memory_space<vmem>>, vector<8x512xf32>
    tpu.vector_store %arg3[%c0_3, %c0_4], %4 {strides = array<i32>} : memref<8x512xf32, #tpu.memory_space<vmem>>, vector<8x512xf32>,
    return
  }
  func.func @transform_0(%arg0: i32) -> (i32, i32) {
    %c0_i32 = arith.constant 0 : i32
    %c0_i32_0 = arith.constant 0 : i32
    return %arg0, %c0_i32 : i32, i32
  }
  func.func @transform_1(%arg0: i32) -> (i32, i32) {
    %c0_i32 = arith.constant 0 : i32
    %c0_i32_0 = arith.constant 0 : i32
    return %arg0, %c0_i32 : i32, i32
  }
  func.func @transform_2(%arg0: i32) -> (i32, i32) {
    %c0_i32 = arith.constant 0 : i32
    %c0_i32_0 = arith.constant 0 : i32
    return %arg0, %c0_i32 : i32, i32
  }
}

</mosaic_0001>

<bundles_post_ra>
// kernel: tpu_custom_call.1
= control target key start
LH: loop header
LB: loop body
LE: loop exit
PB: predicated region body
PF: predicated region fallthrough
CT: control target
= control target key end

     0   :  { %8 = vsyncpa [#allocation4], 0  ;;  %s308_s0 = inlined_call_operand.<no memory space> [shape: s32[1], index: 0, kind: input, shape index: {}]   ;;  %s309_s1 = inlined_call_operand.hbm [shape: f32[8,512], index: 1, kind: input, shape index: {}]   ;;  %s310_s2 = inlined_call_operand.hbm [shape: f32[8,512], index: 2, kind: output, shape index: {}]  }
   0x1   :  { %9 = vsyncpa [#allocation5], 0  ;;  %s251_s9 = smov [#allocation3]   ;;  %s203_s13 = scalar_lea.hbm %s309_s1, 512 }
   0x2   :  { %s18_s10 = sshll.u32 %s251_s9, 4  ;;  %p204_p0 = scmp.ne.s32.totalorder %s309_s1, %s203_s13  ;;  %s19_s10 = int_to_ptr.vmem [resolvable:$true] %s18_s10 }
   0x3   :  { %p207_p1 = scmp.lt.u32.totalorder %s203_s13, %s309_s1 }
   0x5   :  { %p209_p2 = pnand %p207_p1, %p204_p0 }
   0x7   :  { %212 = shalt.err (!%p209_p2)
}
   0x8   :  { %s213_s18 = scalar_lea.vmem %s19_s10, 512  ;;  %p218_p4 = scmp.lt.s32.totalorder %s19_s10, %s19_s10 }
   0x9   :  { %p214_p3 = scmp.ne.s32.totalorder %s19_s10, %s213_s18  ;;  %p219_p5 = scmp.lt.s32.totalorder %s213_s18, %s213_s18 }
   0xb   :  { %p220_p6 = por %p219_p5, %p218_p4 }
   0xd   :  { %p221_p7 = pnand %p220_p6, %p214_p3 }
   0xf   :  { %224 = shalt.err (!%p221_p7)
}
  0x10   :  { %21 = dma.hbm_to_vmem [thread:$0]  %s309_s1, 512, %s19_s10, [#allocation4]  }
  0x11   :  { %247 = dma.done.wait [#allocation4], 512  }
  0x12   :  { %248 = vsyncadd [#allocation4], 4294966784  ;;  %v26_v0 = vlaneseq  ;;  %v283_v1 = vstv %s308_s0  ;;  %s252_s0 = smov [#allocation6]  }
  0x13   :  { %v287_v21 = vxor.u32 466688986, %v283_v1  ;;  %s188_s1 = sshll.u32 %s252_s0, 4  ;;  %s189_s1 = int_to_ptr.vmem [resolvable:$true] %s188_s1 }
  0x14   :  { %v32_v2 = vadd.s32 %v283_v1, %v26_v0  ;;  %s225_s23 = scalar_lea.vmem %s189_s1, 512  ;;  %p230_p9 = scmp.lt.s32.totalorder %s189_s1, %s189_s1 }
  0x15   :  { %p226_p8 = scmp.ne.s32.totalorder %s189_s1, %s225_s23  ;;  %p231_p10 = scmp.lt.s32.totalorder %s225_s23, %s225_s23 }
  0x16   :  { %v33_v3 = vadd.s32 %v32_v2, %v26_v0  ;;  %v34_v4 = vshll.u32 %v32_v2, 13  ;;  %v35_v5 = vshrl.u32 %v32_v2, 19 }
  0x17   :  { %p232_p11 = por %p231_p10, %p230_p9 }
  0x18   :  { %v36_v6 = vor.u32 %v35_v5, %v34_v4 }
  0x19   :  { %p233_p12 = pnand %p232_p11, %p226_p8 }
  0x1a   :  { %v37_v7 = vxor.u32 %v36_v6, %v33_v3 }
  0x1c   :  { %v38_v8 = vadd.s32 %v37_v7, %v33_v3  ;;  %v39_v9 = vshll.u32 %v37_v7, 15  ;;  %v40_v10 = vshrl.u32 %v37_v7, 17 }
  0x1e   :  { %v41_v11 = vor.u32 %v40_v10, %v39_v9 }
  0x20   :  { %v42_v12 = vxor.u32 %v41_v11, %v38_v8 }
  0x22   :  { %v43_v13 = vadd.s32 %v42_v12, %v38_v8  ;;  %v44_v14 = vshll.u32 %v42_v12, 26  ;;  %v45_v15 = vshrl.u32 %v42_v12, 6 }
  0x24   :  { %v46_v16 = vor.u32 %v45_v15, %v44_v14 }
  0x26   :  { %v47_v17 = vxor.u32 %v46_v16, %v43_v13 }
  0x28   :  { %v48_v18 = vadd.s32 %v47_v17, %v43_v13  ;;  %v49_v19 = vshll.u32 %v47_v17, 6  ;;  %v50_v20 = vshrl.u32 %v47_v17, 26 }
  0x2a   :  { %v51_v22 = vor.u32 %v50_v20, %v49_v19  ;;  %v53_v24 = vadd.s32 %v48_v18, %v283_v1 }
  0x2c   :  { %v52_v23 = vxor.u32 %v51_v22, %v48_v18 }
  0x2e   :  { %v54_v25 = vadd.s32 %v52_v23, %v287_v21 }
  0x30   :  { %v55_v26 = vadd.s32 1, %v54_v25 }
  0x32   :  { %v56_v27 = vadd.s32 %v55_v26, %v53_v24  ;;  %v57_v28 = vshll.u32 %v55_v26, 17  ;;  %v58_v29 = vshrl.u32 %v55_v26, 15 }
  0x34   :  { %v59_v30 = vor.u32 %v58_v29, %v57_v28 }
  0x36   :  { %v60_v31 = vxor.u32 %v59_v30, %v56_v27 }
  0x38   :  { %v61_v32 = vadd.s32 %v60_v31, %v56_v27  ;;  %v62_v33 = vshll.u32 %v60_v31, 29  ;;  %v63_v34 = vshrl.u32 %v60_v31, 3 }
  0x3a   :  { %v64_v35 = vor.u32 %v63_v34, %v62_v33 }
  0x3c   :  { %v65_v36 = vxor.u32 %v64_v35, %v61_v32 }
  0x3e   :  { %v66_v37 = vadd.s32 %v65_v36, %v61_v32  ;;  %v67_v38 = vshll.u32 %v65_v36, 16  ;;  %v68_v39 = vshrl.u32 %v65_v36, 16 }
  0x40   :  { %v69_v40 = vor.u32 %v68_v39, %v67_v38 }
  0x42   :  { %v70_v41 = vxor.u32 %v69_v40, %v66_v37 }
  0x44   :  { %v71_v42 = vadd.s32 %v70_v41, %v66_v37  ;;  %v72_v43 = vshll.u32 %v70_v41, 24  ;;  %v73_v44 = vshrl.u32 %v70_v41, 8 }
  0x46   :  { %v74_v45 = vor.u32 %v73_v44, %v72_v43  ;;  %v76_v47 = vadd.s32 %v71_v42, %v287_v21 }
  0x48   :  { %v75_v46 = vxor.u32 %v74_v45, %v71_v42 }
  0x4a   :  { %v78_v48 = vadd.s32 2, %v75_v46 }
  0x4c   :  { %v79_v49 = vadd.s32 %v78_v48, %v76_v47  ;;  %v80_v50 = vshll.u32 %v78_v48, 13  ;;  %v81_v51 = vshrl.u32 %v78_v48, 19 }
  0x4e   :  { %v82_v52 = vor.u32 %v81_v51, %v80_v50 }
  0x50   :  { %v83_v53 = vxor.u32 %v82_v52, %v79_v49 }
  0x52   :  { %v84_v54 = vadd.s32 %v83_v53, %v79_v49  ;;  %v85_v55 = vshll.u32 %v83_v53, 15  ;;  %v86_v56 = vshrl.u32 %v83_v53, 17 }
  0x54   :  { %v87_v57 = vor.u32 %v86_v56, %v85_v55 }
  0x56   :  { %v88_v58 = vxor.u32 %v87_v57, %v84_v54 }
  0x58   :  { %v89_v59 = vadd.s32 %v88_v58, %v84_v54  ;;  %v90_v60 = vshll.u32 %v88_v58, 26  ;;  %v91_v61 = vshrl.u32 %v88_v58, 6 }
  0x5a   :  { %v92_v62 = vor.u32 %v91_v61, %v90_v60 }
  0x5c   :  { %v93_v63 = vxor.u32 %v92_v62, %v89_v59  ;;  %v170_v62 = vld [vmem:[#allocation3] sm:$0xff] }
  0x5e   :  { %v94_v0 = vadd.s32 %v93_v63, %v89_v59  ;;  %v95_v2 = vshll.u32 %v93_v63, 6  ;;  %v96_v3 = vshrl.u32 %v93_v63, 26 }
  0x60   :  { %v97_v4 = vor.u32 %v96_v3, %v95_v2  ;;  %v171_v3 = vld [vmem:[#allocation3 + $0x8] sm:$0xff] }
  0x62   :  { %v98_v5 = vxor.u32 %v97_v4, %v94_v0 }
  0x64   :  { %v100_v6 = vadd.s32 %v98_v5, %v283_v1 }
  0x66   :  { %v101_v7 = vadd.s32 3, %v100_v6  ;;  %v172_v6 = vld [vmem:[#allocation3 + $0x10] sm:$0xff] }
  0x68   :  { %v102_v8 = vadd.s32 %v101_v7, %v94_v0  ;;  %v103_v9 = vshll.u32 %v101_v7, 17  ;;  %v104_v10 = vshrl.u32 %v101_v7, 15 }
  0x6a   :  { %v105_v11 = vor.u32 %v104_v10, %v103_v9  ;;  %v173_v9 = vld [vmem:[#allocation3 + $0x18] sm:$0xff] }
  0x6c   :  { %v106_v12 = vxor.u32 %v105_v11, %v102_v8 }
  0x6e   :  { %v107_v13 = vadd.s32 %v106_v12, %v102_v8  ;;  %v108_v14 = vshll.u32 %v106_v12, 29  ;;  %v109_v15 = vshrl.u32 %v106_v12, 3 }
  0x70   :  { %v110_v16 = vor.u32 %v109_v15, %v108_v14 }
  0x72   :  { %v111_v17 = vxor.u32 %v110_v16, %v107_v13 }
  0x74   :  { %v112_v18 = vadd.s32 %v111_v17, %v107_v13  ;;  %v113_v19 = vshll.u32 %v111_v17, 16  ;;  %v114_v20 = vshrl.u32 %v111_v17, 16 }
  0x76   :  { %v115_v22 = vor.u32 %v114_v20, %v113_v19 }
  0x78   :  { %v116_v23 = vxor.u32 %v115_v22, %v112_v18 }
  0x7a   :  { %v117_v24 = vadd.s32 %v116_v23, %v112_v18  ;;  %v118_v25 = vshll.u32 %v116_v23, 24  ;;  %v119_v26 = vshrl.u32 %v116_v23, 8 }
  0x7c   :  { %v120_v27 = vor.u32 %v119_v26, %v118_v25  ;;  %v122_v29 = vadd.s32 %v117_v24, %v283_v1 }
  0x7e   :  { %v121_v28 = vxor.u32 %v120_v27, %v117_v24 }
  0x80   :  { %v123_v30 = vadd.s32 %v121_v28, %v287_v21 }
  0x82   :  { %v124_v31 = vadd.s32 4, %v123_v30 }
  0x84   :  { %v125_v32 = vadd.s32 %v124_v31, %v122_v29  ;;  %v126_v33 = vshll.u32 %v124_v31, 13  ;;  %v127_v34 = vshrl.u32 %v124_v31, 19 }
  0x86   :  { %v128_v35 = vor.u32 %v127_v34, %v126_v33 }
  0x88   :  { %v129_v36 = vxor.u32 %v128_v35, %v125_v32 }
  0x8a   :  { %v130_v37 = vadd.s32 %v129_v36, %v125_v32  ;;  %v131_v38 = vshll.u32 %v129_v36, 15  ;;  %v132_v39 = vshrl.u32 %v129_v36, 17 }
  0x8c   :  { %v133_v40 = vor.u32 %v132_v39, %v131_v38 }
  0x8e   :  { %v134_v41 = vxor.u32 %v133_v40, %v130_v37 }
  0x90   :  { %v135_v42 = vadd.s32 %v134_v41, %v130_v37  ;;  %v136_v43 = vshll.u32 %v134_v41, 26  ;;  %v137_v44 = vshrl.u32 %v134_v41, 6 }
  0x92   :  { %v138_v45 = vor.u32 %v137_v44, %v136_v43 }
  0x94   :  { %v139_v46 = vxor.u32 %v138_v45, %v135_v42 }
  0x96   :  { %v140_v47 = vadd.s32 %v139_v46, %v135_v42  ;;  %v141_v1 = vshll.u32 %v139_v46, 6  ;;  %v142_v48 = vshrl.u32 %v139_v46, 26 }
  0x98   :  { %v143_v49 = vor.u32 %v142_v48, %v141_v1  ;;  %v145_v51 = vadd.s32 %v140_v47, %v287_v21 }
  0x9a   :  { %v144_v50 = vxor.u32 %v143_v49, %v140_v47 }
  0x9c   :  { %v147_v52 = vadd.s32 5, %v144_v50 }
  0x9e   :  { %v148_v53 = vxor.u32 %v147_v52, %v145_v51 }
  0xa0   :  { %149 = set.rngseed %v148_v53 }
  0xa1   :  { %v150_v54 = vrng }
  0xa2   :  { %v154_v55 = vshrl.u32 %v150_v54, 9  ;;  %v151_v56 = vrng }
  0xa3   :  { %v155_v57 = vshrl.u32 %v151_v56, 9  ;;  %v152_v58 = vrng }
  0xa4   :  { %v158_v59 = vor.u32 1065353216, %v154_v55  ;;  %v156_v60 = vshrl.u32 %v152_v58, 9  ;;  %v153_v61 = vrng }
  0xa5   :  { %v159_v63 = vor.u32 1065353216, %v155_v57  ;;  %v157_v0 = vshrl.u32 %v153_v61, 9 }
  0xa6   :  { %v197_v2 = vadd.f32 -1.0, %v158_v59  ;;  %v160_v4 = vor.u32 1065353216, %v156_v60 }
  0xa7   :  { %v198_v5 = vadd.f32 -1.0, %v159_v63  ;;  %v161_v21 = vor.u32 1065353216, %v157_v0 }
  0xa8   :  { %v174_v7 = vadd.f32 %v197_v2, %v170_v62  ;;  %v199_v8 = vadd.f32 -1.0, %v160_v4 }
  0xa9   :  { %v175_v10 = vadd.f32 %v198_v5, %v171_v3  ;;  %v200_v11 = vadd.f32 -1.0, %v161_v21 }
  0xaa   :  { %178 = vst [vmem:[#allocation6] sm:$0xff] %v174_v7  ;;  %v176_v12 = vadd.f32 %v199_v8, %v172_v6 }
  0xab   :  { %179 = vst [vmem:[#allocation6 + $0x8] sm:$0xff] %v175_v10  ;;  %v177_v13 = vadd.f32 %v200_v11, %v173_v9 }
  0xac   :  { %180 = vst [vmem:[#allocation6 + $0x10] sm:$0xff] %v176_v12 }
  0xad   :  { %181 = vst [vmem:[#allocation6 + $0x18] sm:$0xff] %v177_v13 }
  0xae   :  { %236 = shalt.err (!%p233_p12)
}
  0xaf   :  { %s237_s26 = scalar_lea.hbm %s310_s2, 512 }
  0xb0   :  { %p238_p13 = scmp.ne.s32.totalorder %s310_s2, %s237_s26  ;;  %p241_p0 = scmp.lt.u32.totalorder %s237_s26, %s310_s2 }
  0xb2   :  { %p243_p1 = pnand %p241_p0, %p238_p13 }
  0xb4   :  { %246 = shalt.err (!%p243_p1)
}
  0xb5   :  { %191 = dma.vmem_to_hbm [thread:$0]  %s189_s1, 512, %s310_s2, [#allocation5]  }
  0xb6   :  { %249 = dma.done.wait [#allocation5], 512  }
  0xb7   :  { %250 = vsyncadd [#allocation5], 4294966784 }
  0xb8   :  { %195 = vsyncpa [#allocation4], 1 }
  0xb9   :  { %196 = vsyncpa [#allocation5], 1 }

// kernel: tpu_custom_call.1
= control target key start
LH: loop header
LB: loop body
LE: loop exit
PB: predicated region body
PF: predicated region fallthrough
CT: control target
= control target key end

     0   :  { %7 = vsyncpa [#allocation3], 0  ;;  %s197_s0 = inlined_call_operand.hbm [shape: f32[8,512], index: 0, kind: input, shape index: {}]   ;;  %s198_s1 = inlined_call_operand.hbm [shape: f32[8,512], index: 1, kind: input, shape index: {}]   ;;  %s199_s2 = inlined_call_operand.hbm [shape: f32[8,512], index: 2, kind: output, shape index: {}]  }
   0x1   :  { %8 = vsyncpa [#allocation6], 0 }
   0x2   :  { %9 = vsyncpa [#allocation4], 0  ;;  %s143_s9 = smov [#allocation2]   ;;  %s144_s11 = smov [#allocation5]  }
   0x3   :  { %s16_s10 = sshll.u32 %s143_s9, 4  ;;  %s26_s12 = sshll.u32 %s144_s11, 4  ;;  %s17_s10 = int_to_ptr.vmem [resolvable:$true] %s16_s10  ;;  %s27_s12 = int_to_ptr.vmem [resolvable:$true] %s26_s12 }
   0x4   :  { %s71_s15 = scalar_lea.hbm %s197_s0, 512 }
   0x5   :  { %p72_p0 = scmp.ne.s32.totalorder %s197_s0, %s71_s15  ;;  %p75_p1 = scmp.lt.u32.totalorder %s71_s15, %s197_s0 }
   0x7   :  { %p77_p2 = pnand %p75_p1, %p72_p0 }
   0x9   :  { %80 = shalt.err (!%p77_p2)
}
   0xa   :  { %s81_s20 = scalar_lea.vmem %s17_s10, 512  ;;  %p86_p4 = scmp.lt.s32.totalorder %s17_s10, %s17_s10 }
   0xb   :  { %p82_p3 = scmp.ne.s32.totalorder %s17_s10, %s81_s20  ;;  %p87_p5 = scmp.lt.s32.totalorder %s81_s20, %s81_s20 }
   0xd   :  { %p88_p6 = por %p87_p5, %p86_p4 }
   0xf   :  { %p89_p7 = pnand %p88_p6, %p82_p3 }
  0x11   :  { %92 = shalt.err (!%p89_p7)
}
  0x12   :  { %19 = dma.hbm_to_vmem [thread:$0]  %s197_s0, 512, %s17_s10, [#allocation3]  }
  0x13   :  { %s93_s25 = scalar_lea.hbm %s198_s1, 512 }
  0x14   :  { %p94_p8 = scmp.ne.s32.totalorder %s198_s1, %s93_s25  ;;  %p97_p9 = scmp.lt.u32.totalorder %s93_s25, %s198_s1 }
  0x16   :  { %p99_p10 = pnand %p97_p9, %p94_p8 }
  0x18   :  { %102 = shalt.err (!%p99_p10)
}
  0x19   :  { %s103_s30 = scalar_lea.vmem %s27_s12, 512  ;;  %p108_p12 = scmp.lt.s32.totalorder %s27_s12, %s27_s12 }
  0x1a   :  { %p104_p11 = scmp.ne.s32.totalorder %s27_s12, %s103_s30  ;;  %p109_p13 = scmp.lt.s32.totalorder %s103_s30, %s103_s30 }
  0x1c   :  { %p110_p0 = por %p109_p13, %p108_p12 }
  0x1e   :  { %p111_p1 = pnand %p110_p0, %p104_p11 }
  0x20   :  { %114 = shalt.err (!%p111_p1)
}
  0x21   :  { %29 = dma.hbm_to_vmem [thread:$0]  %s198_s1, 512, %s27_s12, [#allocation6]  }
  0x22   :  { %137 = dma.done.wait [#allocation3], 512  }
  0x23   :  { %138 = vsyncadd [#allocation3], 4294966784 }
  0x24   :  { %139 = dma.done.wait [#allocation6], 512  }
  0x25   :  { %140 = vsyncadd [#allocation6], 4294966784  ;;  %v36_v0 = vld [vmem:[#allocation2] sm:$0xff]  ;;  %v37_v2 = vld [vmem:[#allocation2 + $0x8] sm:$0xff]  ;;  %s145_s4 = smov [#allocation7]  }
  0x26   :  { %v40_v1 = vld [vmem:[#allocation5] sm:$0xff]  ;;  %s58_s5 = sshll.u32 %s145_s4, 4  ;;  %v41_v4 = vld [vmem:[#allocation5 + $0x8] sm:$0xff]  ;;  %v38_v5 = vld [vmem:[#allocation2 + $0x10] sm:$0xff]  ;;  %s59_s5 = int_to_ptr.vmem [resolvable:$true] %s58_s5 }
  0x27   :  { %v44_v3 = vadd.f32 %v40_v1, %v36_v0  ;;  %v42_v6 = vld [vmem:[#allocation5 + $0x10] sm:$0xff]  ;;  %v45_v7 = vadd.f32 %v41_v4, %v37_v2  ;;  %v39_v9 = vld [vmem:[#allocation2 + $0x18] sm:$0xff]  ;;  %s115_s1 = scalar_lea.vmem %s59_s5, 512  ;;  %p120_p3 = scmp.lt.s32.totalorder %s59_s5, %s59_s5 }
  0x28   :  { %v46_v8 = vadd.f32 %v42_v6, %v38_v5  ;;  %v43_v10 = vld [vmem:[#allocation5 + $0x18] sm:$0xff]  ;;  %p116_p2 = scmp.ne.s32.totalorder %s59_s5, %s115_s1  ;;  %p121_p4 = scmp.lt.s32.totalorder %s115_s1, %s115_s1 }
  0x29   :  { %48 = vst [vmem:[#allocation7] sm:$0xff] %v44_v3  ;;  %v47_v11 = vadd.f32 %v43_v10, %v39_v9  ;;  %49 = vst [vmem:[#allocation7 + $0x8] sm:$0xff] %v45_v7 }
  0x2a   :  { %50 = vst [vmem:[#allocation7 + $0x10] sm:$0xff] %v46_v8  ;;  %p122_p5 = por %p121_p4, %p120_p3 }
  0x2b   :  { %51 = vst [vmem:[#allocation7 + $0x18] sm:$0xff] %v47_v11 }
  0x2c   :  { %p123_p6 = pnand %p122_p5, %p116_p2 }
  0x2e   :  { %126 = shalt.err (!%p123_p6)
}
  0x2f   :  { %s127_s8 = scalar_lea.hbm %s199_s2, 512 }
  0x30   :  { %p128_p7 = scmp.ne.s32.totalorder %s199_s2, %s127_s8  ;;  %p131_p8 = scmp.lt.u32.totalorder %s127_s8, %s199_s2 }
  0x32   :  { %p133_p9 = pnand %p131_p8, %p128_p7 }
  0x34   :  { %136 = shalt.err (!%p133_p9)
}
  0x35   :  { %61 = dma.vmem_to_hbm [thread:$0]  %s59_s5, 512, %s199_s2, [#allocation4]  }
  0x36   :  { %141 = dma.done.wait [#allocation4], 512  }
  0x37   :  { %142 = vsyncadd [#allocation4], 4294966784 }
  0x38   :  { %65 = vsyncpa [#allocation3], 1 }
  0x39   :  { %66 = vsyncpa [#allocation6], 1 }
  0x3a   :  { %67 = vsyncpa [#allocation4], 1 }

</bundles_post_ra>
